<compile_context>
chip_gen: v5e
topology: v5e:2x2
jax: 0.10.0
libtpu: 0.0.40
codegen_flags: <defaults>
</compile_context>

<pallas_src>
import math
from functools import partial

import jax
import jax.numpy as jnp
from jax.experimental import pallas as pl
from jax.experimental.pallas import tpu as pltpu


def _round_up(x, m):
    return (x + m - 1) // m * m


def _pick_tile(dim, max_tile, gran):
    """Largest tile <= max_tile that divides `dim` (dim is a multiple of gran)."""
    if dim <= max_tile:
        return dim
    t = (max_tile // gran) * gran
    while t > gran:
        if dim % t == 0:
            return t
        t -= gran
    return gran


def _clamp_vmem(live_bytes):
    # `live_bytes` already includes double-buffering; add headroom and keep the
    # request inside v7x's 64 MiB physical VMEM (and past v5e's 16 MiB default).
    return int(min(max(2 * live_bytes + (4 << 20), 16 << 20), 48 << 20))


_FULLK_VMEM_BUDGET = 32 << 20  # conservative across v5e / v6e / v7x


# ---------------------------------------------------------------------------
# Kernels
# ---------------------------------------------------------------------------
def _fullk_kernel(x_ref, wt_ref, b_ref, o_ref):
    # Whole reduction dim in one tile: no K grid axis, no accumulator RMW.
    x = x_ref[...].astype(wt_ref.dtype)  # in-kernel bf16 cast (VPU, hidden by MXU)
    o_ref[...] = (
        jnp.dot(x, wt_ref[...], preferred_element_type=jnp.float32) + b_ref[...]
    ).astype(o_ref.dtype)


def _tiledk_direct_kernel(x_ref, wt_ref, b_ref, o_ref):
    # f32 output: accumulate straight into o_ref (VMEM-resident across k,
    # because its index_map ignores k) -> no scratch, no finalize copy pass.
    @pl.when(pl.program_id(2) == 0)
    def _():
        o_ref[...] = jnp.zeros(o_ref.shape, o_ref.dtype) + b_ref[...]

    o_ref[...] += jnp.dot(
        x_ref[...].astype(wt_ref.dtype), wt_ref[...],
        preferred_element_type=jnp.float32,
    )


def _tiledk_scratch_kernel(x_ref, wt_ref, b_ref, o_ref, acc_ref):
    # Narrow output dtype: accumulate in f32 scratch, cast once at finalize.
    k = pl.program_id(2)

    @pl.when(k == 0)
    def _():
        acc_ref[...] = jnp.zeros_like(acc_ref)

    acc_ref[...] += jnp.dot(
        x_ref[...].astype(wt_ref.dtype), wt_ref[...],
        preferred_element_type=jnp.float32,
    )

    @pl.when(k == pl.num_programs(2) - 1)
    def _():
        o_ref[...] = (acc_ref[...] + b_ref[...]).astype(o_ref.dtype)


# ---------------------------------------------------------------------------
# pallas_call wrappers
# ---------------------------------------------------------------------------
def _pallas_linear_fullk(x, wt, b, *, tm, tn, out_dtype):
    M, K = x.shape
    _, N = wt.shape
    grid = (M // tm, N // tn)
    ob = jnp.dtype(out_dtype).itemsize
    live = 2 * (tm * K * x.dtype.itemsize + K * tn * wt.dtype.itemsize
                + tn * b.dtype.itemsize + tm * tn * ob)
    cost = pl.CostEstimate(
        flops=2 * M * N * K,
        bytes_accessed=(M * K * x.dtype.itemsize + K * N * wt.dtype.itemsize
                        + N * b.dtype.itemsize + M * N * ob),
        transcendentals=0,
    )
    return pl.pallas_call(
        _fullk_kernel,
        out_shape=jax.ShapeDtypeStruct((M, N), out_dtype),
        grid_spec=pltpu.PrefetchScalarGridSpec(
            num_scalar_prefetch=0,
            grid=grid,
            in_specs=[
                pl.BlockSpec((tm, K), lambda i, j: (i, 0)),
                pl.BlockSpec((K, tn), lambda i, j: (0, j)),
                pl.BlockSpec((1, tn), lambda i, j: (0, j)),
            ],
            out_specs=pl.BlockSpec((tm, tn), lambda i, j: (i, j)),
        ),
        compiler_params=pltpu.CompilerParams(
            dimension_semantics=("parallel", "parallel"),
            vmem_limit_bytes=_clamp_vmem(live),
        ),
        cost_estimate=cost,
    )(x, wt, b)


def _pallas_linear_tiledk(x, wt, b, *, tm, tn, tk, out_dtype):
    M, K = x.shape
    _, N = wt.shape
    grid = (M // tm, N // tn, K // tk)
    direct = jnp.dtype(out_dtype) == jnp.dtype(jnp.float32)
    kernel = _tiledk_direct_kernel if direct else _tiledk_scratch_kernel
    scratch = [] if direct else [pltpu.VMEM((tm, tn), jnp.float32)]
    ob = jnp.dtype(out_dtype).itemsize
    live = (2 * (tm * tk * x.dtype.itemsize + tk * tn * wt.dtype.itemsize
                 + tn * b.dtype.itemsize + tm * tn * ob)
            + (0 if direct else tm * tn * 4))
    cost = pl.CostEstimate(
        flops=2 * M * N * K,
        bytes_accessed=(M * K * x.dtype.itemsize + K * N * wt.dtype.itemsize
                        + N * b.dtype.itemsize + M * N * ob),
        transcendentals=0,
    )
    return pl.pallas_call(
        kernel,
        out_shape=jax.ShapeDtypeStruct((M, N), out_dtype),
        grid_spec=pltpu.PrefetchScalarGridSpec(
            num_scalar_prefetch=0,
            grid=grid,
            in_specs=[
                pl.BlockSpec((tm, tk), lambda i, j, k: (i, k)),
                pl.BlockSpec((tk, tn), lambda i, j, k: (k, j)),
                pl.BlockSpec((1, tn), lambda i, j, k: (0, j)),
            ],
            out_specs=pl.BlockSpec((tm, tn), lambda i, j, k: (i, j)),
            scratch_shapes=scratch,
        ),
        compiler_params=pltpu.CompilerParams(
            dimension_semantics=("parallel", "parallel", "arbitrary"),
            vmem_limit_bytes=_clamp_vmem(live),
        ),
        cost_estimate=cost,
    )(x, wt, b)


# ---------------------------------------------------------------------------
# Jitted forward (pad / kernel / ragged-slice all fused under one jit)
# ---------------------------------------------------------------------------
@partial(jax.jit, static_argnames=("n_out", "tm", "tn", "tk", "fullk",
                                   "precast", "compute_dtype"))
def _linear_forward(x, wt_padded, b_padded, *, n_out, tm, tn, tk, fullk,
                    precast, compute_dtype):
    lead = x.shape[:-1]
    K = x.shape[-1]
    out_dtype = x.dtype
    x2d = x.reshape(-1, K)
    M = x2d.shape[0]
    K_pad, N_pad = wt_padded.shape
    M_pad = _round_up(max(M, 1), 16)

    # Pad only to hardware granularity (M->16, K->128) and only if ragged.
    if M_pad != M or K_pad != K:
        x2d = jnp.pad(x2d, ((0, M_pad - M), (0, K_pad - K)))
    # Only materialize a bf16 copy of x when it is re-read by many N tiles;
    # otherwise the cast happens inside the kernel (saves an HBM round trip).
    if precast and x2d.dtype != compute_dtype:
        x2d = x2d.astype(compute_dtype)

    if fullk:
        y = _pallas_linear_fullk(x2d, wt_padded, b_padded,
                                 tm=tm, tn=tn, out_dtype=out_dtype)
    else:
        y = _pallas_linear_tiledk(x2d, wt_padded, b_padded,
                                  tm=tm, tn=tn, tk=tk, out_dtype=out_dtype)

    # Slice only in the ragged case (aligned shapes pay no extra HBM pass).
    if M_pad != M or N_pad != n_out:
        y = y[:M, :n_out]
    return y.reshape(lead + (n_out,))


# ---------------------------------------------------------------------------
# Inner model (nn.Linear equivalent) and the DummyModel forwarding wrapper
# ---------------------------------------------------------------------------
class InnerLinearModel:
    """Concrete inner model: y = x @ W.T + b over the last dim (nn.Linear)."""

    def __init__(self, n_in, n_out=None, *, key, compute_dtype=jnp.bfloat16,
                 tm_max=512, tn_max=512, tk_max=2048):
        n_out = n_in if n_out is None else n_out
        kw, kb = jax.random.split(key)
        # PyTorch Linear parameter layout: W (out, in), b (out,)
        self.weight = jax.random.normal(kw, (n_out, n_in), jnp.float32) * 0.02
        self.bias = jax.random.normal(kb, (n_out,), jnp.float32) * 0.02
        self.n_in, self.n_out = n_in, n_out
        self.compute_dtype = compute_dtype
        self.tm_max, self.tn_max, self.tk_max = tm_max, tn_max, tk_max

        # Pad K/N to lane granularity (128) ONCE; pre-transpose + cast ONCE so
        # there is no per-call weight.T / pad / cast HBM round trip.
        K_pad = _round_up(n_in, 128)
        N_pad = _round_up(n_out, 128)
        wt = jnp.zeros((K_pad, N_pad), jnp.float32)
        wt = wt.at[:n_in, :n_out].set(self.weight.T)
        self.wt_padded = wt.astype(compute_dtype)
        self.b_padded = (
            jnp.zeros((1, N_pad), jnp.float32).at[0, :n_out].set(self.bias)
        )

    def __call__(self, x):
        M = math.prod(x.shape[:-1])
        M_pad = _round_up(max(M, 1), 16)
        K_pad, N_pad = self.wt_padded.shape

        tm = _pick_tile(M_pad, self.tm_max, 16)
        tn = _pick_tile(N_pad, self.tn_max, 128)
        # v7x megacore: if the parallel (i, j) grid collapses to one tile,
        # halve tm (or tn) so both TensorCores get work.
        if (M_pad // tm) * (N_pad // tn) == 1:
            if M_pad % 32 == 0:
                tm = M_pad // 2
            elif N_pad % 256 == 0:
                tn = N_pad // 2

        xb = jnp.dtype(x.dtype).itemsize
        wb = jnp.dtype(self.compute_dtype).itemsize
        fullk_live = 2 * (tm * K_pad * xb + K_pad * tn * wb + tn * 4 + tm * tn * xb)
        fullk = (K_pad <= self.tk_max) and (fullk_live <= _FULLK_VMEM_BUDGET)
        tk = K_pad if fullk else _pick_tile(K_pad, self.tk_max, 128)

        precast = (N_pad // tn) > 2 and x.dtype != self.compute_dtype

        return _linear_forward(
            x, self.wt_padded, self.b_padded,
            n_out=self.n_out, tm=tm, tn=tn, tk=tk, fullk=fullk,
            precast=precast, compute_dtype=self.compute_dtype,
        )


class DummyModel:
    """Faithful port of wormholes.model_utils.DummyModel: pure forwarding wrapper."""

    def __init__(self, model):
        self.model = model

    def __call__(self, x, *args, **kwargs):
        # forward(x, *args, **kwargs) ignores extra args and returns model(x)
        return self.model(x)


if __name__ == "__main__":
    key = jax.random.PRNGKey(0)
    k_x, k_m1, k_m2, k_x2 = jax.random.split(key, 4)

    # --- primary demo (full-K path, no K grid axis) ------------------------
    batch, seq, hidden = 2, 8, 32
    x = jax.random.normal(k_x, (batch, seq, hidden), jnp.float32)
    inner = InnerLinearModel(hidden, key=k_m1)
    dummy = DummyModel(inner)

    out = dummy(x, "extra_positional_arg", some_kwarg=True)
    out = jax.block_until_ready(out)

    # Reference uses the bf16-rounded weight (weights live in bf16 for the
    # MXU); remaining error is only the in-kernel bf16 activation cast.
    w_eff = inner.weight.astype(jnp.bfloat16).astype(jnp.float32)
    ref = (x.reshape(-1, hidden) @ w_eff.T + inner.bias).reshape(batch, seq, hidden)
    assert out.shape == (batch, seq, hidden)
    assert out.dtype == jnp.float32
    assert jnp.allclose(out, ref, atol=5e-3, rtol=2e-2), float(
        jnp.max(jnp.abs(out - ref))
    )

    # --- tiled-K path, f32 output (direct accumulation into o_ref) ---------
    hidden2 = 256
    x2 = jax.random.normal(k_x2, (batch, seq, hidden2), jnp.float32)
    inner2 = InnerLinearModel(hidden2, key=k_m2, tk_max=128)  # force K grid axis
    out2 = jax.block_until_ready(DummyModel(inner2)(x2))
    w2_eff = inner2.weight.astype(jnp.bfloat16).astype(jnp.float32)
    ref2 = (x2.reshape(-1, hidden2) @ w2_eff.T + inner2.bias).reshape(
        batch, seq, hidden2
    )
    assert out2.dtype == jnp.float32
    assert jnp.allclose(out2, ref2, atol=1e-2, rtol=2e-2), float(
        jnp.max(jnp.abs(out2 - ref2))
    )

    # --- tiled-K path, narrow output dtype (f32 scratch accumulator) -------
    out3 = jax.block_until_ready(DummyModel(inner2)(x2.astype(jnp.bfloat16)))
    assert out3.dtype == jnp.bfloat16
    assert jnp.allclose(out3.astype(jnp.float32), ref2, atol=3e-2, rtol=5e-2), float(
        jnp.max(jnp.abs(out3.astype(jnp.float32) - ref2))
    )

    print("KERNEL_OK")
</pallas_src>

<mosaic_0001>
module attributes {stable_mosaic.version = 11 : i64} {
  func.func @_fullk_kernel(%arg0: i32, %arg1: i32, %arg2: memref<16x128xf32, #tpu.memory_space<vmem>>, %arg3: memref<128x128xbf16, #tpu.memory_space<vmem>>, %arg4: memref<1x128xf32, #tpu.memory_space<vmem>>, %arg5: memref<16x128xf32, #tpu.memory_space<vmem>>) attributes {dimension_semantics = [#tpu.dimension_semantics<parallel>, #tpu.dimension_semantics<parallel>], iteration_bounds = array<i64: 1, 1>, scalar_prefetch = 0 : i64, scratch_operands = 0 : i64, tpu.core_type = #tpu.core_type<tc>, window_params = [{transform_indices = @transform_0, window_bounds = array<i64: 16, 128>}, {transform_indices = @transform_1, window_bounds = array<i64: 128, 128>}, {transform_indices = @transform_2, window_bounds = array<i64: 1, 128>}, {transform_indices = @transform_3, window_bounds = array<i64: 16, 128>}]} {
    %c0 = arith.constant 0 : index
    %c0_0 = arith.constant 0 : index
    %0 = vector.load %arg2[%c0, %c0_0] : memref<16x128xf32, #tpu.memory_space<vmem>>, vector<16x128xf32>
    %1 = arith.truncf %0 : vector<16x128xf32> to vector<16x128xbf16>
    %c0_1 = arith.constant 0 : index
    %c0_2 = arith.constant 0 : index
    %2 = vector.load %arg3[%c0_1, %c0_2] : memref<128x128xbf16, #tpu.memory_space<vmem>>, vector<128x128xbf16>
    %cst = arith.constant dense<0.000000e+00> : vector<16x128xf32>
    %3 = tpu.matmul %1, %2, %cst {dimension_numbers = #tpu.dot_dimension_numbers<[1], [0], [0], [1], [0, 0, 1, 1], [], []>} : vector<16x128xbf16>, vector<128x128xbf16>, vector<16x128xf32> -> vector<16x128xf32>
    %c0_3 = arith.constant 0 : index
    %c0_4 = arith.constant 0 : index
    %4 = vector.load %arg4[%c0_3, %c0_4] : memref<1x128xf32, #tpu.memory_space<vmem>>, vector<1x128xf32>
    %5 = vector.broadcast %4 : vector<1x128xf32> to vector<16x128xf32>
    %6 = arith.addf %3, %5 : vector<16x128xf32>
    %c0_5 = arith.constant 0 : index
    %c0_6 = arith.constant 0 : index
    %7 = vector.load %arg5[%c0_5, %c0_6] : memref<16x128xf32, #tpu.memory_space<vmem>>, vector<16x128xf32>
    tpu.vector_store %arg5[%c0_5, %c0_6], %6 {strides = array<i32>} : memref<16x128xf32, #tpu.memory_space<vmem>>, vector<16x128xf32>,
    return
  }
  func.func @transform_0(%arg0: i32, %arg1: i32) -> (i32, i32) {
    %c0_i32 = arith.constant 0 : i32
    %c0_i32_0 = arith.constant 0 : i32
    return %arg0, %c0_i32 : i32, i32
  }
  func.func @transform_1(%arg0: i32, %arg1: i32) -> (i32, i32) {
    %c0_i32 = arith.constant 0 : i32
    %c0_i32_0 = arith.constant 0 : i32
    return %c0_i32, %arg1 : i32, i32
  }
  func.func @transform_2(%arg0: i32, %arg1: i32) -> (i32, i32) {
    %c0_i32 = arith.constant 0 : i32
    %c0_i32_0 = arith.constant 0 : i32
    return %c0_i32, %arg1 : i32, i32
  }
  func.func @transform_3(%arg0: i32, %arg1: i32) -> (i32, i32) {
    %c0_i32 = arith.constant 0 : i32
    return %arg0, %arg1 : i32, i32
  }
}

</mosaic_0001>

<bundles_post_ra>
// kernel: _linear_forward.1
= control target key start
LH: loop header
LB: loop body
LE: loop exit
PB: predicated region body
PF: predicated region fallthrough
CT: control target
= control target key end

     0   :  { %8 = vsyncpa [#allocation3], 0  ;;  %s192_s15 = smov [#allocation2]   ;;  %s193_s17 = smov 64   ;;  %s233_s0 = inlined_call_operand.vmem [shape: f32[16,128], index: 0, kind: input, shape index: {}]   ;;  %s234_s1 = inlined_call_operand.hbm [shape: bf16[128,128], index: 1, kind: input, shape index: {}]   ;;  %s235_s2 = inlined_call_operand.vmem [shape: f32[1,128], index: 2, kind: input, shape index: {}]   ;;  %s236_s3 = inlined_call_operand.vmem [shape: f32[16,128], index: 3, kind: output, shape index: {}]  }
   0x1   :  { %s15_s14 = sshll.u32 %s234_s1, 4  ;;  %s17_s16 = sshll.u32 %s192_s15, 4  ;;  %s16_s14 = int_to_ptr.hbm [resolvable:$true] %s15_s14  ;;  %s18_s16 = int_to_ptr.vmem [resolvable:$true] %s17_s16 }
   0x2   :  { %s194_s18 = smov 4  }
   0x3   :  { %23 = dma.hbm_to_vmem [thread:$0]  %s16_s14, 1024, %s18_s16, [#allocation3], %s193_s17, %s193_s17, %s194_s18  }
   0x4   :  { %190 = dma.done.wait [#allocation3], 1024  }
   0x5   :  { %191 = vsyncadd [#allocation3], 4294966272  ;;  %v161_v0 = vld [vmem:[#allocation2 + $0x38] sm:$0xff]  ;;  %v160_v1 = vld [vmem:[#allocation2 + $0x30] sm:$0xff] }
   0x6   :  { %101 = vmatpush.bf16.msra.mxu0 %v161_v0  ;;  %v159_v2 = vld [vmem:[#allocation2 + $0x28] sm:$0xff]  ;;  %v158_v3 = vld [vmem:[#allocation2 + $0x20] sm:$0xff]  ;;  %v157_v4 = vld [vmem:[#allocation2 + $0x18] sm:$0xff] }
   0x7   :  { %v156_v5 = vld [vmem:[#allocation2 + $0x10] sm:$0xff]  ;;  %v155_v6 = vld [vmem:[#allocation2 + $0x8] sm:$0xff]  ;;  %v154_v7 = vld [vmem:[#allocation2] sm:$0xff] }
   0x8   :  { %v30_v8 = vld [vmem:[%s233_s0] sm:$0xff]  ;;  %v31_v9 = vld [vmem:[%s233_s0 + $0x8] sm:$0xff] }
   0x9   :  { %v32_v10 = vpack.c.bf16 %v31_v9, %v30_v8  ;;  %v165_v11 = vld [vmem:[%s235_s2] ss:$0 sm:$0xff] }
   0xa   :  { %102 = vmatpush.bf16.msra.mxu0 %v160_v1 }
   0xe   :  { %103 = vmatpush.bf16.msra.mxu0 %v159_v2 }
  0x12   :  { %104 = vmatpush.bf16.msra.mxu0 %v158_v3 }
  0x16   :  { %105 = vmatpush.bf16.msra.mxu0 %v157_v4 }
  0x1a   :  { %106 = vmatpush.bf16.msra.mxu0 %v156_v5 }
  0x1e   :  { %107 = vmatpush.bf16.msra.mxu0 %v155_v6 }
  0x22   :  { %108 = vmatpush.bf16.msra.mxu0 %v154_v7 }
  0x25   :  { %109 = vmatmul.bf16.vlgmr.msra.gmra.mxu0 %v32_v10 }
  0xa2   :  { %v110_v12 = vpop.f32.mrf.mxu0 }
  0xa3   :  { %v111_v13 = vadd.f32 %v165_v11, %v110_v12 }
  0xa5   :  { %115 = vst [vmem:[%s236_s3] sm:$0xff] %v111_v13 }
  0xaa   :  { %v112_v14 = vpop.f32.mrf.mxu0 }
  0xab   :  { %v113_v15 = vadd.f32 %v165_v11, %v112_v14 }
  0xad   :  { %116 = vst [vmem:[%s236_s3 + $0x8] sm:$0xff] %v113_v15 }
  0xae   :  { %121 = vsyncpa [#allocation3], 1 }

</bundles_post_ra>
